<compile_context>
chip_gen: v6e
topology: v6e:2x2x1
jax: 0.10.0
libtpu: 0.0.40
codegen_flags: <defaults>
</compile_context>

<pallas_src>
from typing import List, Sequence

import jax
import jax.numpy as jnp
from jax.experimental import pallas as pl
from jax.experimental.pallas import tpu as pltpu


def _make_fused_kernel(n_mod: int):
    """Kernel body for n_mod modalities fused into one pallas_call.

    Ref order: x_0..x_{n-1}, w_0..w_{n-1}, o_0..o_{n-1}
      x_i: (TM, D_i) tile   w_i: (D_i, P) resident   o_i: (TM, P) tile
    """

    def kernel(*refs):
        x_refs = refs[:n_mod]
        w_refs = refs[n_mod:2 * n_mod]
        o_refs = refs[2 * n_mod:]
        for x_ref, w_ref, o_ref in zip(x_refs, w_refs, o_refs):
            o_ref[...] = jnp.dot(
                x_ref[...], w_ref[...], preferred_element_type=jnp.float32
            ).astype(o_ref.dtype)

    return kernel


def _choose_tile_m(m: int, d_total: int, p_total: int, itemsize: int,
                   vmem_budget_bytes: int = 24 * 1024 * 1024,
                   max_tm: int = 2048) -> int:
    """Largest M tile whose double-buffered in+out footprint fits the budget.

    Kept well under the 32 MiB default scoped-VMEM limit so the same tiling is
    safe on v7x (64 MiB physical VMEM) as well as v5e/v6e (128 MiB).
    """
    bytes_per_row = 2 * itemsize * (d_total + p_total)  # 2x: double buffering
    tm = max(8, min(max_tm, vmem_budget_bytes // max(bytes_per_row, 1)))
    tm = (tm // 8) * 8  # second-to-last block dim must be a multiple of 8 ...
    if tm >= m:
        return m        # ... or equal the full array extent
    return int(tm)


def conv1d_projection_fwd(mods: Sequence[jax.Array],
                          weights_t: Sequence[jax.Array]) -> List[jax.Array]:
    """Fused pointwise (kernel_size=1) Conv1d projection for all modalities.

    mods:      list of (B, L, D_i)   features-last (the module's external layout)
    weights_t: list of (D_i, P)      pre-transposed conv weights (k=1 squeezed)
    returns:   list of (B, L, P)
    """
    n_mod = len(mods)
    B, L = mods[0].shape[0], mods[0].shape[1]
    M = B * L
    P = int(weights_t[0].shape[1])
    dims = [int(w.shape[0]) for w in weights_t]
    dtype = mods[0].dtype
    itemsize = jnp.dtype(dtype).itemsize

    # (B, L, D) -> (B*L, D) is a pure leading-dim merge (no data movement).
    xs = [m.reshape(M, d) for m, d in zip(mods, dims)]

    tm = _choose_tile_m(M, sum(dims), n_mod * P, itemsize)
    grid = (pl.cdiv(M, tm),)

    # x tiles stream over M; weights stay resident (constant block index).
    in_specs = (
        [pl.BlockSpec((tm, d), lambda i: (i, 0)) for d in dims]
        + [pl.BlockSpec((d, P), lambda i: (0, 0)) for d in dims]
    )
    out_specs = [pl.BlockSpec((tm, P), lambda i: (i, 0)) for _ in dims]
    out_shape = [jax.ShapeDtypeStruct((M, P), dtype) for _ in dims]

    cost = pl.CostEstimate(
        flops=sum(2 * M * d * P for d in dims),
        transcendentals=0,
        bytes_accessed=sum(itemsize * (M * d + d * P + M * P) for d in dims),
    )

    outs = pl.pallas_call(
        _make_fused_kernel(n_mod),
        out_shape=out_shape,
        grid=grid,
        in_specs=in_specs,
        out_specs=out_specs,
        compiler_params=pltpu.CompilerParams(
            # M tiles are independent -> shard across both TCs on v7x.
            dimension_semantics=("parallel",),
        ),
        cost_estimate=cost,
    )(*xs, *weights_t)

    return [o.reshape(B, L, P) for o in outs]


class Conv1dProjectionPallas:
    """JAX/Pallas equivalent of slp.modules.fuse.Conv1dProjection
    (defaults: kernel_size=1, padding=0, bias=False)."""

    # TODO(synk): general kernel_size>1 / padding>0 would need an im2col step
    # before the matmul; only the module's default pointwise case is implemented.

    def __init__(self, modality_sizes: Sequence[int], projection_size: int,
                 key: jax.Array):
        self.projection_size = projection_size
        self.weights: List[jax.Array] = []     # (P, D)  PyTorch Conv1d layout (k dim squeezed)
        self.weights_t: List[jax.Array] = []   # (D, P)  pre-transposed, lane-dense out columns
        for i, sz in enumerate(modality_sizes):
            k = jax.random.fold_in(key, i)
            # Deterministic init mimicking PyTorch's uniform(-1/sqrt(fan_in), +)
            bound = 1.0 / float(sz) ** 0.5
            w = jax.random.uniform(
                k, (projection_size, sz), dtype=jnp.float32,
                minval=-bound, maxval=bound,
            )
            self.weights.append(w)
            self.weights_t.append(jnp.transpose(w))

        # NOTE: casting inputs + weights_t to bf16 would ~halve HBM bytes moved
        # (kernel is BW-bound); kept f32 to match the PyTorch module numerics.

    def __call__(self, *mods: jax.Array) -> List[jax.Array]:
        assert len(mods) == len(self.weights_t)
        return conv1d_projection_fwd(list(mods), self.weights_t)


def _reference(mods, weights):
    # Pure-JAX reference: (B, L, D) @ W^T, W is (P, D)
    return [jnp.einsum("bld,pd->blp", m, w) for m, w in zip(mods, weights)]


if __name__ == "__main__":
    key = jax.random.PRNGKey(0)
    B, L = 2, 8
    modality_sizes = [32, 16, 8]   # e.g. text / audio / visual feature dims
    projection_size = 32

    kx, kw = jax.random.split(key)
    mods = []
    for i, sz in enumerate(modality_sizes):
        mods.append(
            jax.random.normal(jax.random.fold_in(kx, i), (B, L, sz),
                              dtype=jnp.float32)
        )

    proj = Conv1dProjectionPallas(modality_sizes, projection_size, kw)

    outs = proj(*mods)
    outs = [jax.block_until_ready(o) for o in outs]

    refs = _reference(mods, proj.weights)
    for o, r in zip(outs, refs):
        assert o.shape == (B, L, projection_size)
        assert jnp.allclose(o, r, atol=1e-5, rtol=1e-5)

    print("KERNEL_OK")
</pallas_src>

<mosaic_0001>
module attributes {stable_mosaic.version = 11 : i64} {
  func.func @kernel(%arg0: i32, %arg1: memref<16x32xf32, #tpu.memory_space<vmem>>, %arg2: memref<16x16xf32, #tpu.memory_space<vmem>>, %arg3: memref<16x8xf32, #tpu.memory_space<vmem>>, %arg4: memref<32x32xf32, #tpu.memory_space<vmem>>, %arg5: memref<16x32xf32, #tpu.memory_space<vmem>>, %arg6: memref<8x32xf32, #tpu.memory_space<vmem>>, %arg7: memref<16x32xf32, #tpu.memory_space<vmem>>, %arg8: memref<16x32xf32, #tpu.memory_space<vmem>>, %arg9: memref<16x32xf32, #tpu.memory_space<vmem>>) attributes {dimension_semantics = [#tpu.dimension_semantics<parallel>], iteration_bounds = array<i64: 1>, scalar_prefetch = 0 : i64, scratch_operands = 0 : i64, tpu.core_type = #tpu.core_type<tc>, window_params = [{transform_indices = @transform_0, window_bounds = array<i64: 16, 32>}, {transform_indices = @transform_1, window_bounds = array<i64: 16, 16>}, {transform_indices = @transform_2, window_bounds = array<i64: 16, 8>}, {pipeline_mode = #tpu.pipeline_mode<synchronous>, transform_indices = @transform_3, window_bounds = array<i64: 32, 32>}, {pipeline_mode = #tpu.pipeline_mode<synchronous>, transform_indices = @transform_4, window_bounds = array<i64: 16, 32>}, {pipeline_mode = #tpu.pipeline_mode<synchronous>, transform_indices = @transform_5, window_bounds = array<i64: 8, 32>}, {transform_indices = @transform_6, window_bounds = array<i64: 16, 32>}, {transform_indices = @transform_7, window_bounds = array<i64: 16, 32>}, {transform_indices = @transform_8, window_bounds = array<i64: 16, 32>}]} {
    %c0 = arith.constant 0 : index
    %c0_0 = arith.constant 0 : index
    %0 = vector.load %arg1[%c0, %c0_0] : memref<16x32xf32, #tpu.memory_space<vmem>>, vector<16x32xf32>
    %c0_1 = arith.constant 0 : index
    %c0_2 = arith.constant 0 : index
    %1 = vector.load %arg4[%c0_1, %c0_2] : memref<32x32xf32, #tpu.memory_space<vmem>>, vector<32x32xf32>
    %cst = arith.constant dense<0.000000e+00> : vector<16x32xf32>
    %2 = tpu.matmul %0, %1, %cst {dimension_numbers = #tpu.dot_dimension_numbers<[1], [0], [0], [1], [0, 0, 1, 1], [], []>} : vector<16x32xf32>, vector<32x32xf32>, vector<16x32xf32> -> vector<16x32xf32>
    %c0_3 = arith.constant 0 : index
    %c0_4 = arith.constant 0 : index
    %3 = vector.load %arg7[%c0_3, %c0_4] : memref<16x32xf32, #tpu.memory_space<vmem>>, vector<16x32xf32>
    tpu.vector_store %arg7[%c0_3, %c0_4], %2 {strides = array<i32>} : memref<16x32xf32, #tpu.memory_space<vmem>>, vector<16x32xf32>,
    %c0_5 = arith.constant 0 : index
    %c0_6 = arith.constant 0 : index
    %4 = vector.load %arg2[%c0_5, %c0_6] : memref<16x16xf32, #tpu.memory_space<vmem>>, vector<16x16xf32>
    %c0_7 = arith.constant 0 : index
    %c0_8 = arith.constant 0 : index
    %5 = vector.load %arg5[%c0_7, %c0_8] : memref<16x32xf32, #tpu.memory_space<vmem>>, vector<16x32xf32>
    %cst_9 = arith.constant dense<0.000000e+00> : vector<16x32xf32>
    %6 = tpu.matmul %4, %5, %cst_9 {dimension_numbers = #tpu.dot_dimension_numbers<[1], [0], [0], [1], [0, 0, 1, 1], [], []>} : vector<16x16xf32>, vector<16x32xf32>, vector<16x32xf32> -> vector<16x32xf32>
    %c0_10 = arith.constant 0 : index
    %c0_11 = arith.constant 0 : index
    %7 = vector.load %arg8[%c0_10, %c0_11] : memref<16x32xf32, #tpu.memory_space<vmem>>, vector<16x32xf32>
    tpu.vector_store %arg8[%c0_10, %c0_11], %6 {strides = array<i32>} : memref<16x32xf32, #tpu.memory_space<vmem>>, vector<16x32xf32>,
    %c0_12 = arith.constant 0 : index
    %c0_13 = arith.constant 0 : index
    %8 = vector.load %arg3[%c0_12, %c0_13] : memref<16x8xf32, #tpu.memory_space<vmem>>, vector<16x8xf32>
    %c0_14 = arith.constant 0 : index
    %c0_15 = arith.constant 0 : index
    %9 = vector.load %arg6[%c0_14, %c0_15] : memref<8x32xf32, #tpu.memory_space<vmem>>, vector<8x32xf32>
    %cst_16 = arith.constant dense<0.000000e+00> : vector<16x32xf32>
    %10 = tpu.matmul %8, %9, %cst_16 {dimension_numbers = #tpu.dot_dimension_numbers<[1], [0], [0], [1], [0, 0, 1, 1], [], []>} : vector<16x8xf32>, vector<8x32xf32>, vector<16x32xf32> -> vector<16x32xf32>
    %c0_17 = arith.constant 0 : index
    %c0_18 = arith.constant 0 : index
    %11 = vector.load %arg9[%c0_17, %c0_18] : memref<16x32xf32, #tpu.memory_space<vmem>>, vector<16x32xf32>
    tpu.vector_store %arg9[%c0_17, %c0_18], %10 {strides = array<i32>} : memref<16x32xf32, #tpu.memory_space<vmem>>, vector<16x32xf32>,
    return
  }
  func.func @transform_0(%arg0: i32) -> (i32, i32) {
    %c0_i32 = arith.constant 0 : i32
    %c0_i32_0 = arith.constant 0 : i32
    return %arg0, %c0_i32 : i32, i32
  }
  func.func @transform_1(%arg0: i32) -> (i32, i32) {
    %c0_i32 = arith.constant 0 : i32
    %c0_i32_0 = arith.constant 0 : i32
    return %arg0, %c0_i32 : i32, i32
  }
  func.func @transform_2(%arg0: i32) -> (i32, i32) {
    %c0_i32 = arith.constant 0 : i32
    %c0_i32_0 = arith.constant 0 : i32
    return %arg0, %c0_i32 : i32, i32
  }
  func.func @transform_3(%arg0: i32) -> (i32, i32) {
    %c0_i32 = arith.constant 0 : i32
    %c0_i32_0 = arith.constant 0 : i32
    %c0_i32_1 = arith.constant 0 : i32
    return %c0_i32, %c0_i32_0 : i32, i32
  }
  func.func @transform_4(%arg0: i32) -> (i32, i32) {
    %c0_i32 = arith.constant 0 : i32
    %c0_i32_0 = arith.constant 0 : i32
    %c0_i32_1 = arith.constant 0 : i32
    return %c0_i32, %c0_i32_0 : i32, i32
  }
  func.func @transform_5(%arg0: i32) -> (i32, i32) {
    %c0_i32 = arith.constant 0 : i32
    %c0_i32_0 = arith.constant 0 : i32
    %c0_i32_1 = arith.constant 0 : i32
    return %c0_i32, %c0_i32_0 : i32, i32
  }
  func.func @transform_6(%arg0: i32) -> (i32, i32) {
    %c0_i32 = arith.constant 0 : i32
    %c0_i32_0 = arith.constant 0 : i32
    return %arg0, %c0_i32 : i32, i32
  }
  func.func @transform_7(%arg0: i32) -> (i32, i32) {
    %c0_i32 = arith.constant 0 : i32
    %c0_i32_0 = arith.constant 0 : i32
    return %arg0, %c0_i32 : i32, i32
  }
  func.func @transform_8(%arg0: i32) -> (i32, i32) {
    %c0_i32 = arith.constant 0 : i32
    %c0_i32_0 = arith.constant 0 : i32
    return %arg0, %c0_i32 : i32, i32
  }
}

</mosaic_0001>

<bundles_post_ra>
// kernel: tpu_custom_call.1
= control target key start
LH: loop header
LB: loop body
LE: loop exit
PB: predicated region body
PF: predicated region fallthrough
CT: control target
= control target key end

     0   :  { %14 = vsyncpa [#allocation3], 0  ;;  %s673_s0 = inlined_call_operand.vmem [shape: f32[16,32], index: 0, kind: input, shape index: {}]   ;;  %s674_s1 = inlined_call_operand.hbm [shape: f32[16,16], index: 1, kind: input, shape index: {}]   ;;  %s675_s2 = inlined_call_operand.vmem [shape: f32[16,8], index: 2, kind: input, shape index: {}]   ;;  %s676_s3 = inlined_call_operand.hbm [shape: f32[32,32], index: 3, kind: input, shape index: {}]   ;;  %s677_s4 = inlined_call_operand.hbm [shape: f32[16,32], index: 4, kind: input, shape index: {}]   ;;  %s678_s5 = inlined_call_operand.vmem [shape: f32[8,32], index: 5, kind: input, shape index: {}]   ;;  %s679_s6 = inlined_call_operand.hbm [shape: f32[16,32], index: 6, kind: output, shape index: {0}]   ;;  %s680_s7 = inlined_call_operand.hbm [shape: f32[16,32], index: 7, kind: output, shape index: {1}]   ;;  %s681_s8 = inlined_call_operand.hbm [shape: f32[16,32], index: 8, kind: output, shape index: {2}]  }
   0x1   :  { %15 = vsyncpa [#allocation6], 0 }
   0x2   :  { %16 = vsyncpa [#allocation4], 0 }
   0x3   :  { %17 = vsyncpa [#allocation10], 0  ;;  %s561_s27 = smov [#allocation5]   ;;  %s562_s29 = smov [#allocation2]  }
   0x4   :  { %s39_s28 = sshll.u32 %s561_s27, 4  ;;  %s25_s30 = sshll.u32 %s562_s29, 4  ;;  %s40_s28 = int_to_ptr.vmem [resolvable:$true] %s39_s28  ;;  %s26_s30 = int_to_ptr.vmem [resolvable:$true] %s25_s30 }
   0x5   :  { %s441_s9 = scalar_lea.vmem %s40_s28, 512  ;;  %p446_p1 = scmp.lt.s32.totalorder %s40_s28, %s40_s28 }
   0x6   :  { %p442_p0 = scmp.ne.s32.totalorder %s40_s28, %s441_s9  ;;  %p447_p2 = scmp.lt.s32.totalorder %s441_s9, %s441_s9 }
   0x8   :  { %p448_p3 = por %p447_p2, %p446_p1 }
   0xa   :  { %p449_p4 = pnand %p448_p3, %p442_p0 }
   0xc   :  { %452 = shalt.err (!%p449_p4)
}
   0xd   :  { %s563_s10 = smov 128   ;;  %s564_s11 = smov 8  }
   0xe   :  { %45 = dma.hbm_to_vmem [thread:$0]  %s676_s3, 512, %s40_s28, [#allocation6], %s563_s10, %s563_s10, %s564_s11  }
   0xf   :  { %s461_s14 = scalar_lea.vmem %s26_s30, 256  ;;  %p466_p6 = scmp.lt.s32.totalorder %s26_s30, %s26_s30 }
  0x10   :  { %p462_p5 = scmp.ne.s32.totalorder %s26_s30, %s461_s14  ;;  %p467_p7 = scmp.lt.s32.totalorder %s461_s14, %s461_s14 }
  0x12   :  { %p468_p8 = por %p467_p7, %p466_p6 }
  0x14   :  { %p469_p9 = pnand %p468_p8, %p462_p5 }
  0x16   :  { %472 = shalt.err (!%p469_p9)
}
  0x17   :  { %31 = dma.hbm_to_vmem [thread:$0]  %s674_s1, 256, %s26_s30, [#allocation3], %s563_s10, %s563_s10, %s564_s11  }
  0x18   :  { %s565_s17 = smov [#allocation7]  }
  0x19   :  { %s51_s18 = sshll.u32 %s565_s17, 4  ;;  %s52_s18 = int_to_ptr.vmem [resolvable:$true] %s51_s18 }
  0x1a   :  { %s481_s19 = scalar_lea.vmem %s52_s18, 256  ;;  %p486_p11 = scmp.lt.s32.totalorder %s52_s18, %s52_s18 }
  0x1b   :  { %p482_p10 = scmp.ne.s32.totalorder %s52_s18, %s481_s19  ;;  %p487_p12 = scmp.lt.s32.totalorder %s481_s19, %s481_s19 }
  0x1d   :  { %p488_p13 = por %p487_p12, %p486_p11 }
  0x1f   :  { %p489_p0 = pnand %p488_p13, %p482_p10 }
  0x21   :  { %492 = shalt.err (!%p489_p0)
}
  0x22   :  { %57 = dma.hbm_to_vmem [thread:$0]  %s677_s4, 256, %s52_s18, [#allocation6], %s563_s10, %s563_s10, %s564_s11  }
  0x23   :  { %553 = dma.done.wait [#allocation3], 256  }
  0x24   :  { %554 = vsyncadd [#allocation3], 4294967040 }
  0x25   :  { %555 = dma.done.wait [#allocation6], 768  }
  0x26   :  { %556 = vsyncadd [#allocation6], 4294966528  ;;  %v74_v0 = vld [vmem:[#allocation5 + $0x18] sm:$0xff]  ;;  %v162_v1 = vld [vmem:[#allocation7 + $0x8] sm:$0xff]  ;;  %vm163_vm0 = vcmask 130048   ;;  %vm75_vm1 = vcmask 261120  }
  0x27   :  { %v73_v2 = vld [vmem:[#allocation5 + $0x10] sm:$0xff]  ;;  %402 = vmatprep.subr.mxu0 %v74_v0  ;;  %413 = vmatprep.subr.mxu1 %v162_v1  ;;  %v161_v3 = vld [vmem:[#allocation7] sm:$0xff]  ;;  %v72_v5 = vld [vmem:[#allocation5 + $0x8] sm:$0xff]  ;;  %vm250_vm2 = vcmask 64512   ;;  %s566_s28 = smov [#allocation9]  }
  0x28   :  { %403 = vmatpush3.msra.mxu0 %v74_v0  ;;  %414 = vmatpush3.msra.mxu1 %v162_v1  ;;  %v159_v4 = vld [vmem:[#allocation2] sm:$0xff]  ;;  %v160_v6 = vld [vmem:[#allocation2 + $0x8] sm:$0xff]  ;;  %v71_v8 = vld [vmem:[#allocation5] sm:$0xff]  ;;  %s351_s29 = sshll.u32 %s566_s28, 4  ;;  %s352_s29 = int_to_ptr.vmem [resolvable:$true] %s351_s29 }
  0x29   :  { %404 = vmatprep.subr.mxu0 %v73_v2  ;;  %415 = vmatprep.subr.mxu1 %v161_v3  ;;  %v249_v7 = vld [vmem:[%s678_s5] sm:$0xff]  ;;  %v70_v11 = vld [vmem:[%s673_s0 + $0x8] sm:$0xff]  ;;  %s493_s12 = scalar_lea.vmem %s352_s29, 256  ;;  %p498_p2 = scmp.lt.s32.totalorder %s352_s29, %s352_s29 }
  0x2a   :  { %405 = vmatpush3.msra.mxu0 %v73_v2  ;;  %416 = vmatpush3.msra.mxu1 %v161_v3  ;;  %v69_v9 = vld [vmem:[%s673_s0] sm:$0xff]  ;;  %v248_v12 = vld [vmem:[%s675_s2 + $0x8] sm:$0xff]  ;;  %s567_s0 = smov [#allocation8]   ;;  %p494_p1 = scmp.ne.s32.totalorder %s352_s29, %s493_s12 }
  0x2b   :  { %417 = vmatprep.mubr.msk.f32.mxu1 %vm163_vm0, %v159_v4  ;;  %406 = vmatprep.subr.mxu0 %v72_v5  ;;  %v247_v10 = vld [vmem:[%s675_s2] sm:$0xff]  ;;  %s339_s30 = sshll.u32 %s567_s0, 4  ;;  %s568_s2 = smov [#allocation11]   ;;  %s340_s30 = int_to_ptr.vmem [resolvable:$true] %s339_s30 }
  0x2c   :  { %418 = vmatmul.mubr.msk.f32.vlgmr.msra.gmra.mxu1 %vm163_vm0, %v160_v6  ;;  %420 = vmatprep.subr.mxu1 %v249_v7  ;;  %s363_s9 = sshll.u32 %s568_s2, 4  ;;  %p499_p3 = scmp.lt.s32.totalorder %s493_s12, %s493_s12  ;;  %s364_s9 = int_to_ptr.vmem [resolvable:$true] %s363_s9 }
  0x2d   :  { %407 = vmatpush3.msra.mxu0 %v72_v5  ;;  %421 = vmatpush3.msra.mxu1 %v249_v7 }
  0x2e   :  { %408 = vmatprep.subr.mxu0 %v71_v8  ;;  %410 = vmatprep.mubr.msk.f32.mxu0 %vm75_vm1, %v69_v9  ;;  %p500_p4 = por %p499_p3, %p498_p2 }
  0x2f   :  { %409 = vmatpush3.msra.mxu0 %v71_v8  ;;  %422 = vmatprep.mubr.msk.f32.mxu1 %vm250_vm2, %v247_v10 }
  0x30   :  { %411 = vmatmul.mubr.msk.f32.vlgmr.msra.gmra.mxu0 %vm75_vm1, %v70_v11  ;;  %423 = vmatmul.mubr.msk.f32.vlgmr.msra.gmra.mxu1 %vm250_vm2, %v248_v12  ;;  %p501_p5 = pnand %p500_p4, %p494_p1 }
  0xec   :  { %v419_v13 = vpop.f32.mrf.mxu1 }
  0xed   :  { %246 = vst.msk [vmem:[#allocation9 + $0x8] sm:$0xff] %vm75_vm1, %v419_v13 }
  0xee   :  { %v236_v14 = vpop.f32.mrf.mxu1 }
  0xef   :  { %245 = vst.msk [vmem:[#allocation9] sm:$0xff] %vm75_vm1, %v236_v14 }
  0xf0   :  { %v412_v15 = vpop.f32.mrf.mxu0  ;;  %v424_v16 = vpop.f32.mrf.mxu1 }
  0xf1   :  { %504 = shalt.err (!%p501_p5)
}
  0xf2   :  { %357 = dma.vmem_to_hbm [thread:$0]  %s352_s29, 256, %s680_s7, [#allocation10], %s563_s10, %s563_s10, %s564_s11   ;;  %158 = vst.msk [vmem:[#allocation8 + $0x8] sm:$0xff] %vm75_vm1, %v412_v15  ;;  %333 = vst.msk [vmem:[#allocation11 + $0x8] sm:$0xff] %vm75_vm1, %v424_v16  ;;  %v148_v17 = vpop.f32.mrf.mxu0  ;;  %v323_v18 = vpop.f32.mrf.mxu1 }
  0xf3   :  { %157 = vst.msk [vmem:[#allocation8] sm:$0xff] %vm75_vm1, %v148_v17  ;;  %332 = vst.msk [vmem:[#allocation11] sm:$0xff] %vm75_vm1, %v323_v18  ;;  %s513_s15 = scalar_lea.vmem %s340_s30, 256  ;;  %p518_p7 = scmp.lt.s32.totalorder %s340_s30, %s340_s30 }
  0xf4   :  { %p514_p6 = scmp.ne.s32.totalorder %s340_s30, %s513_s15  ;;  %p519_p8 = scmp.lt.s32.totalorder %s513_s15, %s513_s15 }
  0xf6   :  { %p520_p9 = por %p519_p8, %p518_p7 }
  0xf8   :  { %p521_p10 = pnand %p520_p9, %p514_p6 }
  0xfa   :  { %524 = shalt.err (!%p521_p10)
}
  0xfb   :  { %345 = dma.vmem_to_hbm [thread:$0]  %s340_s30, 256, %s679_s6, [#allocation4], %s563_s10, %s563_s10, %s564_s11  }
  0xfc   :  { %s533_s17 = scalar_lea.vmem %s364_s9, 256  ;;  %p538_p12 = scmp.lt.s32.totalorder %s364_s9, %s364_s9 }
  0xfd   :  { %p534_p11 = scmp.ne.s32.totalorder %s364_s9, %s533_s17  ;;  %p539_p13 = scmp.lt.s32.totalorder %s533_s17, %s533_s17 }
  0xff   :  { %p540_p0 = por %p539_p13, %p538_p12 }
 0x101   :  { %p541_p1 = pnand %p540_p0, %p534_p11 }
 0x103   :  { %544 = shalt.err (!%p541_p1)
}
 0x104   :  { %369 = dma.vmem_to_hbm [thread:$0]  %s364_s9, 256, %s681_s8, [#allocation10], %s563_s10, %s563_s10, %s564_s11  }
 0x105   :  { %557 = dma.done.wait [#allocation4], 256  }
 0x106   :  { %558 = vsyncadd [#allocation4], 4294967040 }
 0x107   :  { %559 = dma.done.wait [#allocation10], 512  }
 0x108   :  { %560 = vsyncadd [#allocation10], 4294966784 }
 0x109   :  { %379 = vsyncpa [#allocation3], 1 }
 0x10a   :  { %380 = vsyncpa [#allocation6], 1 }
 0x10b   :  { %381 = vsyncpa [#allocation4], 1 }
 0x10c   :  { %382 = vsyncpa [#allocation10], 1 }

</bundles_post_ra>
